<compile_context>
chip_gen: v6e
topology: v6e:2x2x1
jax: 0.10.0
libtpu: 0.0.40
codegen_flags: <defaults>
</compile_context>

<pallas_src>
import functools

import jax
import jax.numpy as jnp
from jax import lax
from jax.experimental import pallas as pl
from jax.experimental.pallas import tpu as pltpu


# ------------------------------ Pallas kernel -------------------------------

def _convt_bn_relu_kernel(w_ref, x_ref, o_ref, *, apply_relu):
    # w_ref: (Cout, KD+1)  x_ref: (KD+1, TM)  o_ref: (Cout, TM)
    # Last weight column is the folded conv-bias + eval-BatchNorm shift; the
    # matching patch row is all-ones, so the bias add is inside the MXU dot.
    acc = jnp.dot(w_ref[...], x_ref[...], preferred_element_type=jnp.float32)
    if apply_relu:
        acc = jnp.maximum(acc, 0.0)
    o_ref[...] = acc.astype(o_ref.dtype)


def _pick_hw_tile(hw_pad):
    # Single block per image when the per-image work is small (the kernel is
    # launch-bound there, so extra grid steps are pure overhead on single-TC
    # v5e/v6e); for large images take the biggest 128-multiple tile dividing
    # hw_pad to amortize the ~0.35 us/step pipeline overhead.  VMEM is never
    # the constraint at these shapes (a 4096-wide double-buffered tile is only
    # a few MiB, << 64 MiB even on v7x).
    if hw_pad <= 4096:
        return hw_pad
    for cand in (4096, 2048, 1024, 512, 256, 128):
        if hw_pad % cand == 0:
            return cand
    return hw_pad  # unreachable: hw_pad is always a multiple of 128


# ------------------------------ host wrapper --------------------------------

def conv_transpose_block_forward(x_nchw, params, *, kernel_size=3, stride=1,
                                 padding=None, batch_norm=True, upsample=None,
                                 activation=True, eps=1e-5,
                                 use_bf16_inputs=False):
    """ConvTransposeBlock forward. x: [N, Cin, H, W] f32 -> [N, Cout, Ho, Wo]."""
    K = kernel_size
    pad = padding if padding is not None else K // 2
    if stride != 1:
        # TODO(synk): stride > 1 transposed conv (input dilation) not implemented.
        raise NotImplementedError("only stride=1 ConvTranspose2d is supported")
    assert pad <= K - 1, "padding must be <= kernel_size - 1"

    w = params["conv_w"]                      # [Cin, Cout, K, K] (PyTorch ConvTranspose2d)
    b = params["conv_b"]                      # [Cout]
    N, Cin, H, W = x_nchw.shape
    Cout = w.shape[1]
    p_eff = K - 1 - pad                       # equivalent-correlation padding
    Ho = H - 2 * pad + K - 1
    Wo = W - 2 * pad + K - 1
    HW = Ho * Wo
    KD = K * K * Cin

    # ---- fold conv bias + eval-mode BatchNorm into the weights / one shift ----
    if batch_norm:
        inv_std = 1.0 / jnp.sqrt(params["bn_var"] + eps)
        scale = params["bn_gamma"] * inv_std                        # [Cout]
        shift = (b - params["bn_mean"]) * scale + params["bn_beta"]
    else:
        scale = jnp.ones((Cout,), jnp.float32)
        shift = b
    # stride-1 ConvTranspose == correlation with flipped kernel, swapped io dims
    w_eq = jnp.transpose(w[:, :, ::-1, ::-1], (1, 0, 2, 3))         # [Cout, Cin, K, K]
    w_eq = w_eq * scale[:, None, None, None]                        # BN scale folded in
    w2 = jnp.transpose(w_eq, (0, 2, 3, 1)).reshape(Cout, KD)        # kd ordered (kh, kw, ci)
    w_aug = jnp.concatenate([w2, shift.reshape(Cout, 1)], axis=1)   # [Cout, KD+1], shift folded

    # ---- glue: pad + extract K*K taps, lane-dense per image as (KD, HW) ------
    # TODO(synk): extract taps in-kernel (lane rolls on a flat padded layout) to
    # remove the K^2 HBM expansion once H*W is large enough to be DMA-bound; at
    # this size the op is launch-overhead bound, and allow_input_fusion below
    # lets XLA fold this glue into the pallas call's operand production.
    x_pad = jnp.pad(x_nchw, ((0, 0), (0, 0), (p_eff, p_eff), (p_eff, p_eff)))
    taps = [x_pad[:, :, kh:kh + Ho, kw:kw + Wo]                     # each [N, Cin, Ho, Wo]
            for kh in range(K) for kw in range(K)]
    patches = jnp.stack(taps, axis=1).reshape(N, KD, HW)            # kd ordered (kh, kw, ci)

    hw_pad = ((HW + 127) // 128) * 128
    if hw_pad != HW:
        patches = jnp.pad(patches, ((0, 0), (0, 0), (0, hw_pad - HW)))
    ones_row = jnp.ones((N, 1, hw_pad), patches.dtype)
    patches_aug = jnp.concatenate([patches, ones_row], axis=1)      # [N, KD+1, hw_pad]

    # Optional bf16 operands (f32 accumulation) to halve the patch-stream DMA
    # bytes when H*W grows (most useful on v5e's lower HBM bandwidth).
    in_dtype = jnp.bfloat16 if use_bf16_inputs else jnp.float32
    w_aug = w_aug.astype(in_dtype)
    patches_aug = patches_aug.astype(in_dtype)

    tm = _pick_hw_tile(hw_pad)
    grid = (N, hw_pad // tm)

    # ---- Pallas kernel: conv-transpose matmul fused with BN shift + ReLU -----
    out = pl.pallas_call(
        functools.partial(_convt_bn_relu_kernel, apply_relu=bool(activation)),
        out_shape=jax.ShapeDtypeStruct((N, Cout, hw_pad), jnp.float32),
        grid_spec=pltpu.PrefetchScalarGridSpec(
            num_scalar_prefetch=0,
            grid=grid,
            in_specs=[
                pl.BlockSpec((Cout, KD + 1), lambda n, i: (0, 0)),        # folded weights+shift
                pl.BlockSpec((None, KD + 1, tm), lambda n, i: (n, 0, i)), # patch columns
            ],
            out_specs=pl.BlockSpec((None, Cout, tm), lambda n, i: (n, 0, i)),
        ),
        compiler_params=pltpu.CompilerParams(
            dimension_semantics=("parallel", "arbitrary"),
            allow_input_fusion=[False, True],
        ),
    )(w_aug, patches_aug)

    # Free view when hw_pad == HW (true whenever Ho*Wo is a multiple of 128).
    y = out[:, :, :HW].reshape(N, Cout, Ho, Wo)

    if upsample:
        # nn.Upsample default mode='nearest'; ReLU (applied in-kernel) commutes
        # with nearest-neighbor replication, so fusing it before is equivalent.
        # TODO(synk): fuse the repeat into the kernel store (widen the output
        # block by s0*s1) to avoid this extra write+read of the activation.
        s = upsample if isinstance(upsample, (tuple, list)) else (upsample, upsample)
        y = jnp.repeat(jnp.repeat(y, int(s[0]), axis=2), int(s[1]), axis=3)
    return y


# ------------------------------ reference (JAX) ------------------------------

def conv_transpose_block_reference(x_nchw, params, *, kernel_size=3, stride=1,
                                   padding=None, batch_norm=True, upsample=None,
                                   activation=True, eps=1e-5):
    K = kernel_size
    pad = padding if padding is not None else K // 2
    w, b = params["conv_w"], params["conv_b"]
    # ConvTranspose2d == input-dilated correlation with the spatially flipped
    # kernel; PyTorch weight layout (Cin, Cout, K, K) matches rhs spec "IOHW".
    y = lax.conv_general_dilated(
        x_nchw, w[:, :, ::-1, ::-1],
        window_strides=(1, 1),
        padding=[(K - 1 - pad, K - 1 - pad)] * 2,
        lhs_dilation=(stride, stride),
        dimension_numbers=("NCHW", "IOHW", "NCHW"))
    y = y + b[None, :, None, None]
    if batch_norm:
        y = (y - params["bn_mean"][None, :, None, None]) / jnp.sqrt(
            params["bn_var"] + eps)[None, :, None, None]
        y = (y * params["bn_gamma"][None, :, None, None]
             + params["bn_beta"][None, :, None, None])
    if upsample:
        s = upsample if isinstance(upsample, (tuple, list)) else (upsample, upsample)
        y = jnp.repeat(jnp.repeat(y, int(s[0]), axis=2), int(s[1]), axis=3)
    if activation:
        y = jnp.maximum(y, 0.0)
    return y


# ----------------------------------- main ------------------------------------

if __name__ == "__main__":
    key = jax.random.PRNGKey(0)
    k_x, k_w, k_b, k_g, k_bt, k_m, k_v = jax.random.split(key, 7)

    N, Cin, H, W = 2, 4, 16, 16
    Cout, K = 8, 3

    x = jax.random.normal(k_x, (N, Cin, H, W), dtype=jnp.float32)

    fan_in = Cin * K * K
    bound = 1.0 / (fan_in ** 0.5)
    params = {
        "conv_w": jax.random.uniform(k_w, (Cin, Cout, K, K), jnp.float32,
                                     -bound, bound),
        "conv_b": jax.random.uniform(k_b, (Cout,), jnp.float32, -bound, bound),
        # eval-mode BatchNorm running statistics (deterministic, non-trivial)
        # TODO(synk): training-mode BN (batch statistics) not implemented.
        "bn_gamma": 1.0 + 0.1 * jax.random.normal(k_g, (Cout,), jnp.float32),
        "bn_beta": 0.1 * jax.random.normal(k_bt, (Cout,), jnp.float32),
        "bn_mean": 0.1 * jax.random.normal(k_m, (Cout,), jnp.float32),
        "bn_var": 0.5 + jnp.abs(jax.random.normal(k_v, (Cout,), jnp.float32)),
    }

    fwd = jax.jit(functools.partial(conv_transpose_block_forward, kernel_size=K,
                                    stride=1, padding=None, batch_norm=True,
                                    upsample=None, activation=True,
                                    use_bf16_inputs=False))
    out = fwd(x, params)
    jax.block_until_ready(out)

    ref = conv_transpose_block_reference(x, params, kernel_size=K, stride=1,
                                         padding=None, batch_norm=True,
                                         upsample=None, activation=True)
    assert out.shape == (N, Cout, H, W), out.shape
    assert jnp.allclose(out, ref, rtol=1e-3, atol=1e-3), (
        float(jnp.max(jnp.abs(out - ref))))

    print("KERNEL_OK")
</pallas_src>

<mosaic_0001>
module attributes {stable_mosaic.version = 11 : i64} {
  func.func @_convt_bn_relu_kernel(%arg0: i32, %arg1: i32, %arg2: memref<8x37xf32, #tpu.memory_space<vmem>>, %arg3: memref<1x37x256xf32, #tpu.memory_space<vmem>>, %arg4: memref<1x8x256xf32, #tpu.memory_space<vmem>>) attributes {dimension_semantics = [#tpu.dimension_semantics<parallel>, #tpu.dimension_semantics<arbitrary>], iteration_bounds = array<i64: 2, 1>, scalar_prefetch = 0 : i64, scratch_operands = 0 : i64, tpu.core_type = #tpu.core_type<tc>, window_params = [{pipeline_mode = #tpu.pipeline_mode<synchronous>, transform_indices = @transform_0, window_bounds = array<i64: 8, 37>}, {transform_indices = @transform_1, window_bounds = array<i64: 1, 37, 256>}, {transform_indices = @transform_2, window_bounds = array<i64: 1, 8, 256>}]} {
    %c0 = arith.constant 0 : index
    %c0_0 = arith.constant 0 : index
    %0 = vector.load %arg2[%c0, %c0_0] : memref<8x37xf32, #tpu.memory_space<vmem>>, vector<8x37xf32>
    %c0_1 = arith.constant 0 : index
    %c0_2 = arith.constant 0 : index
    %c0_3 = arith.constant 0 : index
    %1 = vector.load %arg3[%c0_1, %c0_2, %c0_3] : memref<1x37x256xf32, #tpu.memory_space<vmem>>, vector<1x37x256xf32>
    %2 = vector.shape_cast %1 : vector<1x37x256xf32> to vector<37x256xf32>
    %cst = arith.constant dense<0.000000e+00> : vector<8x256xf32>
    %3 = tpu.matmul %0, %2, %cst {dimension_numbers = #tpu.dot_dimension_numbers<[1], [0], [0], [1], [0, 0, 1, 1], [], []>} : vector<8x37xf32>, vector<37x256xf32>, vector<8x256xf32> -> vector<8x256xf32>
    %cst_4 = arith.constant 0.000000e+00 : f32
    %4 = vector.broadcast %cst_4 : f32 to vector<8x256xf32>
    %5 = arith.maximumf %3, %4 : vector<8x256xf32>
    %c0_5 = arith.constant 0 : index
    %c0_6 = arith.constant 0 : index
    %c0_7 = arith.constant 0 : index
    %6 = vector.load %arg4[%c0_5, %c0_6, %c0_7] : memref<1x8x256xf32, #tpu.memory_space<vmem>>, vector<1x8x256xf32>
    %7 = vector.shape_cast %6 : vector<1x8x256xf32> to vector<8x256xf32>
    %8 = vector.shape_cast %5 : vector<8x256xf32> to vector<1x8x256xf32>
    tpu.vector_store %arg4[%c0_5, %c0_6, %c0_7], %8 {strides = array<i32>} : memref<1x8x256xf32, #tpu.memory_space<vmem>>, vector<1x8x256xf32>,
    return
  }
  func.func @transform_0(%arg0: i32, %arg1: i32) -> (i32, i32) {
    %c0_i32 = arith.constant 0 : i32
    %c0_i32_0 = arith.constant 0 : i32
    %c0_i32_1 = arith.constant 0 : i32
    return %c0_i32, %c0_i32_0 : i32, i32
  }
  func.func @transform_1(%arg0: i32, %arg1: i32) -> (i32, i32, i32) {
    %c0_i32 = arith.constant 0 : i32
    %c0_i32_0 = arith.constant 0 : i32
    return %arg0, %c0_i32, %arg1 : i32, i32, i32
  }
  func.func @transform_2(%arg0: i32, %arg1: i32) -> (i32, i32, i32) {
    %c0_i32 = arith.constant 0 : i32
    %c0_i32_0 = arith.constant 0 : i32
    return %arg0, %c0_i32, %arg1 : i32, i32, i32
  }
}

</mosaic_0001>

<bundles_post_ra>
// kernel: conv_transpose_block_forward.2
= control target key start
LH: loop header
LB: loop body
LE: loop exit
PB: predicated region body
PF: predicated region fallthrough
CT: control target
= control target key end

     0   :  { %s574_s14 = smov 0   ;;  %s576_s15 = smov 0   ;;  %s622_s0 = inlined_call_operand.vmem [shape: f32[8,37], index: 0, kind: input, shape index: {}]   ;;  %s623_s1 = inlined_call_operand.vmem [shape: f32[2,36,256], index: 1, kind: input, shape index: {}]   ;;  %s624_s2 = inlined_call_operand.<no memory space> [shape: f32[], index: 2, kind: input, shape index: {}]   ;;  %s625_s3 = inlined_call_operand.vmem [shape: f32[2,8,256], index: 3, kind: output, shape index: {}]  }
   0x1   :  { %v8_v0 = vstv %s624_s2  ;;  %s578_s16 = smov 0  }
   0x2 LB: > { %s26_s17 = sadd.s32 1, %s544_s15  ;;  %p481_p0 = scmp.ge.s32.totalorder %s548_s16, 1  ;;  %s548_s16 = sphi %s578_s16, %s14_s16   ;;  %s544_s15 = sphi %s576_s15, %s627_s15   ;;  %s540_s14 = sphi %s574_s14, %s626_s14  }
   0x3   : > { %p28_p1 = scmp.ge.s32.totalorder %s26_s17, 2  ;;  %p135_p2 = scmp.lt.s32.totalorder %s548_s16, 3 }
   0x5   : > { %s629_s17 = smov (%p28_p1, %s26_s17), 0  ;;  %p136_p3 = pnand %p481_p0, %p135_p2 }
   0x7   : > { %139 = sbr.rel (%p136_p3) target bundleno = 236 (0xec), region = 28 }
   0xc   : > { %p166_p4 = scmp.lt.s32.totalorder %s540_s14, 1  ;;  %v273_v1 = vlaneseq  ;;  %v550_v2 = vmov 0.0   ;;  %vm308_vm1 = vcmask 1044480   ;;  %v293_v19 = vld [vmem:[%s622_s0] sm:$0xff]  ;;  %vm304_vm2 = vcmask 302080  }
   0xd   : > { %379 = vmatprep.mubr.f32.mxu0 %v550_v2 }
   0xe   : > { %s631_s14 = smov (!%p166_p4, %s540_s14), 1  ;;  %v274_v3 = vshrl.u32 %v273_v1, 7 }
   0xf   : > { %s500_s18 = smul.u32 80, %s631_s14  ;;  %s499_s28 = sshll.u32 %s631_s14, 4 }
  0x10   : > { %v275_v4 = vadd.s32 32, %v274_v3  ;;  %s183_s4 = scalar_lea.vmem %s625_s3, %s499_s28 }
  0x11   : > { %s173_s21 = scalar_lea.vmem %s623_s1, %s500_s18 }
  0x12   : > { %vm276_vm0 = vcmp.lt.s32.totalorder %v275_v4, 36  ;;  %v493_v5 = vld [vmem:[%s173_s21 + $0x48] sm:$0xff]  ;;  %v492_v6 = vld [vmem:[%s173_s21 + $0x40] sm:$0xff]  ;;  %v491_v7 = vld [vmem:[%s173_s21 + $0x38] sm:$0xff] }
  0x13   : > { %v288_v8 = vsel %vm276_vm0, %v493_v5, %v8_v0  ;;  %v277_v9 = vsel %vm276_vm0, %v492_v6, %v8_v0  ;;  %v490_v10 = vld [vmem:[%s173_s21 + $0x30] sm:$0xff]  ;;  %v489_v11 = vld [vmem:[%s173_s21 + $0x28] sm:$0xff]  ;;  %v488_v12 = vld [vmem:[%s173_s21 + $0x20] sm:$0xff] }
  0x14   : > { %292 = vst [vmem:[#allocation7 + $0x38] sm:$0xff] %v288_v8  ;;  %281 = vst [vmem:[#allocation7 + $0x40] sm:$0xff] %v277_v9  ;;  %v487_v13 = vld [vmem:[%s173_s21 + $0x18] sm:$0xff]  ;;  %v486_v14 = vld [vmem:[%s173_s21 + $0x10] sm:$0xff] }
  0x15   : > { %v485_v15 = vld [vmem:[%s173_s21 + $0x8] sm:$0xff]  ;;  %v185_v16 = vld [vmem:[%s173_s21] sm:$0xff] }
  0x1b   : > { %v303_v17 = vld [vmem:[#allocation7 + $0x38] sm:$0x1f]  ;;  %v302_v18 = vld [vmem:[#allocation7 + $0x40] sm:$0x1f] }
  0x1c   : > { %494 = vmatprep.subr.msk.mxu0 %vm308_vm1, %v303_v17 }
  0x1d   : > { %495 = vmatpush1.msk.msra.mxu0 %vm308_vm1, %v302_v18 }
  0x1e   : > { %339 = vmatprep.subr.mxu0 %v491_v7 }
  0x1f   : > { %340 = vmatpush1.msra.mxu0 %v490_v10 }
  0x20   : > { %341 = vmatprep.subr.mxu0 %v489_v11 }
  0x21   : > { %342 = vmatpush1.msra.mxu0 %v488_v12 }
  0x22   : > { %343 = vmatprep.subr.mxu0 %v487_v13 }
  0x23   : > { %344 = vmatpush1.msra.mxu0 %v486_v14 }
  0x24   : > { %345 = vmatprep.subr.mxu0 %v485_v15 }
  0x25   : > { %346 = vmatpush1.msra.mxu0 %v185_v16 }
  0x26   : > { %496 = vmatmul.mubr.msk.f32.vlgmr.msra.gmra.mxu0 %vm304_vm2, %v293_v19 }
  0xe6   : > { %v381_v20 = vpop.f32.mrf.mxu0 }
  0xe7   : > { %v386_v21 = vmax.f32 %v381_v20, 0.0 }
  0xe8   : > { %v383_v22 = vpop.f32.mrf.mxu0 }
  0xe9   : > { %388 = vst [vmem:[%s183_s4] sm:$0xff] %v386_v21  ;;  %v387_v23 = vmax.f32 %v383_v22, 0.0 }
  0xeb   : > { %389 = vst [vmem:[%s183_s4 + $0x8] sm:$0xff] %v387_v23 }
  0xec PF: > { %s14_s16 = sadd.s32 1, %s548_s16   ;;  %s626_s14 = smov %s544_s15 }
  0xed   : > { %p11_p5 = scmp.ge.s32.totalorder %s14_s16, 4   ;;  %s627_s15 = smov %s629_s17 }
  0xef   :  { %13 = sbr.rel (!%p11_p5) target bundleno = 2 (0x2), region = 76 }

</bundles_post_ra>
